<compile_context>
chip_gen: v7x
topology: tpu7x:2x2x1
jax: 0.10.0
libtpu: 0.0.40
codegen_flags: <defaults>
</compile_context>

<pallas_src>
import functools

import jax
import jax.numpy as jnp
import numpy as np
from jax.experimental import pallas as pl
from jax.experimental.pallas import tpu as pltpu

PHI = 0.05


def _round_up(n, m):
    return ((n + m - 1) // m) * m


def _perturbation_kernel(s_ref, a_ref, w1s_ref, w1a_ref, b1_ref,
                         w2_ref, b2_ref, w3_ref, b3_ref, out_ref):
    wdt = w1s_ref.dtype          # stored weight dtype (bf16 default, f32 for validation)
    s = s_ref[...]               # f32
    a = a_ref[...]               # f32, reused for the residual add / clamp

    # layer 1: ReLU([s, a] @ W1 + b1), concat folded into two dots.
    # Activations are cast to the weight dtype so the MXU runs its native
    # low-precision path; accumulation is always f32.
    h1 = jnp.dot(s.astype(wdt), w1s_ref[...], preferred_element_type=jnp.float32)
    h1 = h1 + jnp.dot(a.astype(wdt), w1a_ref[...], preferred_element_type=jnp.float32)
    h1 = jnp.maximum(h1 + b1_ref[...], 0.0)

    # layer 2: ReLU(h1 @ W2 + b2)
    h2 = jnp.dot(h1.astype(wdt), w2_ref[...], preferred_element_type=jnp.float32)
    h2 = jnp.maximum(h2 + b2_ref[...], 0.0)

    # layer 3: tanh(h2 @ W3 + b3)
    p = jnp.dot(h2.astype(wdt), w3_ref[...], preferred_element_type=jnp.float32)
    p = jnp.tanh(p + b3_ref[...])

    # perturbed action = clamp(a + phi * p, -1, 1)
    out_ref[...] = jnp.clip(a + PHI * p, -1.0, 1.0)


def prepare_params(params, s_dim, weight_dtype=jnp.bfloat16):
    """One-time param prep (call once, reuse every forward).

    Splits W1 into state / action row-blocks (removes the per-call concat),
    zero-pads hidden dims to lane-friendly widths (exact: padded rows/cols are
    zero and ReLU(0)=0, so real outputs are unchanged), and casts weights to
    `weight_dtype` (biases stay f32)."""
    w1, b1, w2, b2, w3, b3 = params
    in_dim, h1_dim = w1.shape
    h2_dim = w2.shape[1]
    a_dim = w3.shape[1]

    h1p = _round_up(h1_dim, 128)   # 400 -> 512
    h2p = _round_up(h2_dim, 128)   # 300 -> 384

    w1 = w1.astype(jnp.float32)
    w1s = jnp.zeros((s_dim, h1p), jnp.float32).at[:, :h1_dim].set(w1[:s_dim])
    w1a = jnp.zeros((in_dim - s_dim, h1p), jnp.float32).at[:, :h1_dim].set(w1[s_dim:])
    b1p = jnp.zeros((1, h1p), jnp.float32).at[:, :h1_dim].set(b1[None, :].astype(jnp.float32))
    w2p = jnp.zeros((h1p, h2p), jnp.float32).at[:h1_dim, :h2_dim].set(w2.astype(jnp.float32))
    b2p = jnp.zeros((1, h2p), jnp.float32).at[:, :h2_dim].set(b2[None, :].astype(jnp.float32))
    w3p = jnp.zeros((h2p, a_dim), jnp.float32).at[:h2_dim, :].set(w3.astype(jnp.float32))
    b3p = b3[None, :].astype(jnp.float32)

    wd = weight_dtype
    prepared = (w1s.astype(wd), w1a.astype(wd), b1p,
                w2p.astype(wd), b2p, w3p.astype(wd), b3p)
    return jax.tree_util.tree_map(jax.block_until_ready, prepared)


@functools.partial(jax.jit, static_argnames=("block_b",))
def perturbation_forward(s, a, prepared, block_b=256):
    """s: [B, s_dim], a: [B, a_dim]; prepared = prepare_params(...).

    block_b: batch tile. Small B -> a single grid step (fully resident);
    large B -> batch-tiled grid with resident weights and "parallel" semantics
    (v7x TensorCore sharding / DMA-compute overlap).  Use 128 on v5e,
    256-512 on v6e/v7x."""
    w1s, w1a, b1, w2, b2, w3, b3 = prepared
    s = s.astype(jnp.float32)
    a = a.astype(jnp.float32)
    B, s_dim = s.shape
    a_dim = a.shape[1]

    tb = B if B <= block_b else block_b
    tb = max(_round_up(tb, 8), 8)
    bp = _round_up(B, tb)
    if bp != B:                      # pad batch to a tile multiple (no-op when aligned)
        s = jnp.pad(s, ((0, bp - B), (0, 0)))
        a = jnp.pad(a, ((0, bp - B), (0, 0)))

    def batch_spec(d):
        return pl.BlockSpec((tb, d), lambda i: (i, 0))

    def resident(arr):
        # Full block, constant block index -> DMA'd once, stays VMEM-resident.
        return pl.BlockSpec(arr.shape, lambda i: (0, 0))

    out = pl.pallas_call(
        _perturbation_kernel,
        out_shape=jax.ShapeDtypeStruct((bp, a_dim), jnp.float32),
        grid=(bp // tb,),
        in_specs=[batch_spec(s_dim), batch_spec(a_dim),
                  resident(w1s), resident(w1a), resident(b1),
                  resident(w2), resident(b2), resident(w3), resident(b3)],
        out_specs=batch_spec(a_dim),
        compiler_params=pltpu.CompilerParams(
            dimension_semantics=("parallel",)),
    )(s, a, w1s, w1a, b1, w2, b2, w3, b3)

    return out[:B] if bp != B else out


def init_params(key, s_dim, a_dim):
    """Deterministic init mimicking nn.Linear defaults (U[-1/sqrt(fan_in), ...]).
    Weights are stored as (in_features, out_features), i.e. PyTorch W.T."""
    dims = [(s_dim + a_dim, 400), (400, 300), (300, a_dim)]
    params = []
    for (fan_in, fan_out) in dims:
        key, kw, kb = jax.random.split(key, 3)
        bound = 1.0 / np.sqrt(fan_in)
        w = jax.random.uniform(kw, (fan_in, fan_out), jnp.float32, -bound, bound)
        b = jax.random.uniform(kb, (fan_out,), jnp.float32, -bound, bound)
        params += [w, b]
    return tuple(params)


def perturbation_reference(s, a, params):
    """Pure-JAX reference matching the PyTorch forward exactly (f32 weights)."""
    w1, b1, w2, b2, w3, b3 = params
    x = jnp.concatenate([s, a], axis=1)
    x = jax.nn.relu(x @ w1 + b1)
    x = jax.nn.relu(x @ w2 + b2)
    p = jnp.tanh(x @ w3 + b3)
    return jnp.clip(a + PHI * p, -1.0, 1.0)


if __name__ == "__main__":
    s_dim, a_dim = 16, 8

    key = jax.random.PRNGKey(0)
    kp, ks, ka = jax.random.split(key, 3)
    params = init_params(kp, s_dim, a_dim)

    prepared_f32 = prepare_params(params, s_dim, weight_dtype=jnp.float32)
    prepared_bf16 = prepare_params(params, s_dim)  # default: bf16 weights

    # 1) small batch, f32-weight path (casts are no-ops): bit-tight check.
    batch = 8
    s = jax.random.normal(ks, (batch, s_dim), jnp.float32)
    a = jnp.tanh(jax.random.normal(ka, (batch, a_dim), jnp.float32))  # actions in [-1, 1]
    ref = perturbation_reference(s, a, params)

    out_f32 = jax.block_until_ready(perturbation_forward(s, a, prepared_f32))
    np.testing.assert_allclose(np.asarray(out_f32), np.asarray(ref),
                               rtol=1e-5, atol=1e-5)

    # 2) small batch, default bf16-weight path (native bf16 MXU dots).
    out_bf16 = jax.block_until_ready(perturbation_forward(s, a, prepared_bf16))
    np.testing.assert_allclose(np.asarray(out_bf16), np.asarray(ref),
                               rtol=2e-2, atol=2e-2)

    # 3) larger batch exercising the multi-block "parallel" batch grid
    #    (weights resident across grid steps).
    batch_l = 256
    ks2, ka2 = jax.random.split(jax.random.PRNGKey(1))
    s_l = jax.random.normal(ks2, (batch_l, s_dim), jnp.float32)
    a_l = jnp.tanh(jax.random.normal(ka2, (batch_l, a_dim), jnp.float32))
    ref_l = perturbation_reference(s_l, a_l, params)
    out_l = jax.block_until_ready(
        perturbation_forward(s_l, a_l, prepared_bf16, block_b=128))
    np.testing.assert_allclose(np.asarray(out_l), np.asarray(ref_l),
                               rtol=2e-2, atol=2e-2)

    print("KERNEL_OK")
</pallas_src>

<mosaic_0001>
module attributes {stable_mosaic.version = 11 : i64} {
  func.func @_perturbation_kernel(%arg0: i32, %arg1: memref<8x16xf32, #tpu.memory_space<vmem>>, %arg2: memref<8x8xf32, #tpu.memory_space<vmem>>, %arg3: memref<16x512xf32, #tpu.memory_space<vmem>>, %arg4: memref<8x512xf32, #tpu.memory_space<vmem>>, %arg5: memref<1x512xf32, #tpu.memory_space<vmem>>, %arg6: memref<512x384xf32, #tpu.memory_space<vmem>>, %arg7: memref<1x384xf32, #tpu.memory_space<vmem>>, %arg8: memref<384x8xf32, #tpu.memory_space<vmem>>, %arg9: memref<1x8xf32, #tpu.memory_space<vmem>>, %arg10: memref<8x8xf32, #tpu.memory_space<vmem>>) attributes {dimension_semantics = [#tpu.dimension_semantics<parallel>], iteration_bounds = array<i64: 1>, scalar_prefetch = 0 : i64, scratch_operands = 0 : i64, tpu.core_type = #tpu.core_type<tc>, window_params = [{transform_indices = @transform_0, window_bounds = array<i64: 8, 16>}, {transform_indices = @transform_1, window_bounds = array<i64: 8, 8>}, {pipeline_mode = #tpu.pipeline_mode<synchronous>, transform_indices = @transform_2, window_bounds = array<i64: 16, 512>}, {pipeline_mode = #tpu.pipeline_mode<synchronous>, transform_indices = @transform_3, window_bounds = array<i64: 8, 512>}, {pipeline_mode = #tpu.pipeline_mode<synchronous>, transform_indices = @transform_4, window_bounds = array<i64: 1, 512>}, {pipeline_mode = #tpu.pipeline_mode<synchronous>, transform_indices = @transform_5, window_bounds = array<i64: 512, 384>}, {pipeline_mode = #tpu.pipeline_mode<synchronous>, transform_indices = @transform_6, window_bounds = array<i64: 1, 384>}, {pipeline_mode = #tpu.pipeline_mode<synchronous>, transform_indices = @transform_7, window_bounds = array<i64: 384, 8>}, {pipeline_mode = #tpu.pipeline_mode<synchronous>, transform_indices = @transform_8, window_bounds = array<i64: 1, 8>}, {transform_indices = @transform_9, window_bounds = array<i64: 8, 8>}]} {
    %c0 = arith.constant 0 : index
    %c0_0 = arith.constant 0 : index
    %0 = vector.load %arg1[%c0, %c0_0] : memref<8x16xf32, #tpu.memory_space<vmem>>, vector<8x16xf32>
    %c0_1 = arith.constant 0 : index
    %c0_2 = arith.constant 0 : index
    %1 = vector.load %arg2[%c0_1, %c0_2] : memref<8x8xf32, #tpu.memory_space<vmem>>, vector<8x8xf32>
    %c0_3 = arith.constant 0 : index
    %c0_4 = arith.constant 0 : index
    %2 = vector.load %arg3[%c0_3, %c0_4] : memref<16x512xf32, #tpu.memory_space<vmem>>, vector<16x512xf32>
    %cst = arith.constant dense<0.000000e+00> : vector<8x512xf32>
    %3 = tpu.matmul %0, %2, %cst {dimension_numbers = #tpu.dot_dimension_numbers<[1], [0], [0], [1], [0, 0, 1, 1], [], []>} : vector<8x16xf32>, vector<16x512xf32>, vector<8x512xf32> -> vector<8x512xf32>
    %c0_5 = arith.constant 0 : index
    %c0_6 = arith.constant 0 : index
    %4 = vector.load %arg4[%c0_5, %c0_6] : memref<8x512xf32, #tpu.memory_space<vmem>>, vector<8x512xf32>
    %cst_7 = arith.constant dense<0.000000e+00> : vector<8x512xf32>
    %5 = tpu.matmul %1, %4, %cst_7 {dimension_numbers = #tpu.dot_dimension_numbers<[1], [0], [0], [1], [0, 0, 1, 1], [], []>} : vector<8x8xf32>, vector<8x512xf32>, vector<8x512xf32> -> vector<8x512xf32>
    %6 = arith.addf %3, %5 : vector<8x512xf32>
    %c0_8 = arith.constant 0 : index
    %c0_9 = arith.constant 0 : index
    %7 = vector.load %arg5[%c0_8, %c0_9] : memref<1x512xf32, #tpu.memory_space<vmem>>, vector<1x512xf32>
    %8 = vector.broadcast %7 : vector<1x512xf32> to vector<8x512xf32>
    %9 = arith.addf %6, %8 : vector<8x512xf32>
    %cst_10 = arith.constant 0.000000e+00 : f32
    %10 = vector.broadcast %cst_10 : f32 to vector<8x512xf32>
    %11 = arith.maximumf %9, %10 : vector<8x512xf32>
    %c0_11 = arith.constant 0 : index
    %c0_12 = arith.constant 0 : index
    %12 = vector.load %arg6[%c0_11, %c0_12] : memref<512x384xf32, #tpu.memory_space<vmem>>, vector<512x384xf32>
    %cst_13 = arith.constant dense<0.000000e+00> : vector<8x384xf32>
    %13 = tpu.matmul %11, %12, %cst_13 {dimension_numbers = #tpu.dot_dimension_numbers<[1], [0], [0], [1], [0, 0, 1, 1], [], []>} : vector<8x512xf32>, vector<512x384xf32>, vector<8x384xf32> -> vector<8x384xf32>
    %c0_14 = arith.constant 0 : index
    %c0_15 = arith.constant 0 : index
    %14 = vector.load %arg7[%c0_14, %c0_15] : memref<1x384xf32, #tpu.memory_space<vmem>>, vector<1x384xf32>
    %15 = vector.broadcast %14 : vector<1x384xf32> to vector<8x384xf32>
    %16 = arith.addf %13, %15 : vector<8x384xf32>
    %cst_16 = arith.constant 0.000000e+00 : f32
    %17 = vector.broadcast %cst_16 : f32 to vector<8x384xf32>
    %18 = arith.maximumf %16, %17 : vector<8x384xf32>
    %c0_17 = arith.constant 0 : index
    %c0_18 = arith.constant 0 : index
    %19 = vector.load %arg8[%c0_17, %c0_18] : memref<384x8xf32, #tpu.memory_space<vmem>>, vector<384x8xf32>
    %cst_19 = arith.constant dense<0.000000e+00> : vector<8x8xf32>
    %20 = tpu.matmul %18, %19, %cst_19 {dimension_numbers = #tpu.dot_dimension_numbers<[1], [0], [0], [1], [0, 0, 1, 1], [], []>} : vector<8x384xf32>, vector<384x8xf32>, vector<8x8xf32> -> vector<8x8xf32>
    %c0_20 = arith.constant 0 : index
    %c0_21 = arith.constant 0 : index
    %21 = vector.load %arg9[%c0_20, %c0_21] : memref<1x8xf32, #tpu.memory_space<vmem>>, vector<1x8xf32>
    %22 = vector.broadcast %21 : vector<1x8xf32> to vector<8x8xf32>
    %23 = arith.addf %20, %22 : vector<8x8xf32>
    %24 = math.tanh %23 : vector<8x8xf32>
    %cst_22 = arith.constant 5.000000e-02 : f32
    %25 = vector.broadcast %cst_22 : f32 to vector<8x8xf32>
    %26 = arith.mulf %25, %24 : vector<8x8xf32>
    %27 = arith.addf %1, %26 : vector<8x8xf32>
    %cst_23 = arith.constant -1.000000e+00 : f32
    %cst_24 = arith.constant 1.000000e+00 : f32
    %28 = vector.broadcast %cst_23 : f32 to vector<8x8xf32>
    %29 = arith.maximumf %28, %27 : vector<8x8xf32>
    %30 = vector.broadcast %cst_24 : f32 to vector<8x8xf32>
    %31 = arith.minimumf %30, %29 : vector<8x8xf32>
    %c0_25 = arith.constant 0 : index
    %c0_26 = arith.constant 0 : index
    %32 = vector.load %arg10[%c0_25, %c0_26] : memref<8x8xf32, #tpu.memory_space<vmem>>, vector<8x8xf32>
    tpu.vector_store %arg10[%c0_25, %c0_26], %31 {strides = array<i32>} : memref<8x8xf32, #tpu.memory_space<vmem>>, vector<8x8xf32>,
    return
  }
  func.func @transform_0(%arg0: i32) -> (i32, i32) {
    %c0_i32 = arith.constant 0 : i32
    %c0_i32_0 = arith.constant 0 : i32
    return %arg0, %c0_i32 : i32, i32
  }
  func.func @transform_1(%arg0: i32) -> (i32, i32) {
    %c0_i32 = arith.constant 0 : i32
    %c0_i32_0 = arith.constant 0 : i32
    return %arg0, %c0_i32 : i32, i32
  }
  func.func @transform_2(%arg0: i32) -> (i32, i32) {
    %c0_i32 = arith.constant 0 : i32
    %c0_i32_0 = arith.constant 0 : i32
    %c0_i32_1 = arith.constant 0 : i32
    return %c0_i32, %c0_i32_0 : i32, i32
  }
  func.func @transform_3(%arg0: i32) -> (i32, i32) {
    %c0_i32 = arith.constant 0 : i32
    %c0_i32_0 = arith.constant 0 : i32
    %c0_i32_1 = arith.constant 0 : i32
    return %c0_i32, %c0_i32_0 : i32, i32
  }
  func.func @transform_4(%arg0: i32) -> (i32, i32) {
    %c0_i32 = arith.constant 0 : i32
    %c0_i32_0 = arith.constant 0 : i32
    %c0_i32_1 = arith.constant 0 : i32
    return %c0_i32, %c0_i32_0 : i32, i32
  }
  func.func @transform_5(%arg0: i32) -> (i32, i32) {
    %c0_i32 = arith.constant 0 : i32
    %c0_i32_0 = arith.constant 0 : i32
    %c0_i32_1 = arith.constant 0 : i32
    return %c0_i32, %c0_i32_0 : i32, i32
  }
  func.func @transform_6(%arg0: i32) -> (i32, i32) {
    %c0_i32 = arith.constant 0 : i32
    %c0_i32_0 = arith.constant 0 : i32
    %c0_i32_1 = arith.constant 0 : i32
    return %c0_i32, %c0_i32_0 : i32, i32
  }
  func.func @transform_7(%arg0: i32) -> (i32, i32) {
    %c0_i32 = arith.constant 0 : i32
    %c0_i32_0 = arith.constant 0 : i32
    %c0_i32_1 = arith.constant 0 : i32
    return %c0_i32, %c0_i32_0 : i32, i32
  }
  func.func @transform_8(%arg0: i32) -> (i32, i32) {
    %c0_i32 = arith.constant 0 : i32
    %c0_i32_0 = arith.constant 0 : i32
    %c0_i32_1 = arith.constant 0 : i32
    return %c0_i32, %c0_i32_0 : i32, i32
  }
  func.func @transform_9(%arg0: i32) -> (i32, i32) {
    %c0_i32 = arith.constant 0 : i32
    %c0_i32_0 = arith.constant 0 : i32
    return %arg0, %c0_i32 : i32, i32
  }
}

</mosaic_0001>

<bundles_post_ra>
// kernel: perturbation_forward.1
= control target key start
LH: loop header
LB: loop body
LE: loop exit
PB: predicated region body
PF: predicated region fallthrough
CT: control target
= control target key end

     0   :  { %14 = vsyncpa [#allocation3], 0  ;;  %s1895_s0 = inlined_call_operand.vmem [shape: f32[8,16], index: 0, kind: input, shape index: {}]   ;;  %s1896_s1 = inlined_call_operand.vmem [shape: f32[8,8], index: 1, kind: input, shape index: {}]   ;;  %s1897_s2 = inlined_call_operand.vmem [shape: f32[16,512], index: 2, kind: input, shape index: {}]   ;;  %s1898_s3 = inlined_call_operand.vmem [shape: f32[8,512], index: 3, kind: input, shape index: {}]   ;;  %s1899_s4 = inlined_call_operand.vmem [shape: f32[1,512], index: 4, kind: input, shape index: {}]   ;;  %s1900_s5 = inlined_call_operand.hbm [shape: f32[512,384], index: 5, kind: input, shape index: {}]   ;;  %s1901_s6 = inlined_call_operand.vmem [shape: f32[1,384], index: 6, kind: input, shape index: {}]   ;;  %s1902_s7 = inlined_call_operand.vmem [shape: f32[384,8], index: 7, kind: input, shape index: {}]   ;;  %s1903_s8 = inlined_call_operand.vmem [shape: f32[1,8], index: 8, kind: input, shape index: {}]   ;;  %s1904_s9 = inlined_call_operand.hbm [shape: f32[8,8], index: 9, kind: output, shape index: {}]  }
   0x1   :  { %15 = vsyncpa [#allocation4], 0  ;;  %s1578_s30 = smov [#allocation2]   ;;  %s1530_s13 = scalar_lea.hbm %s1900_s5, 24576 }
   0x2   :  { %s31_s10 = sshll.u32 %s1578_s30, 4  ;;  %p1531_p0 = scmp.ne.s32.totalorder %s1900_s5, %s1530_s13  ;;  %s32_s10 = int_to_ptr.vmem [resolvable:$true] %s31_s10 }
   0x3   :  { %p1534_p1 = scmp.lt.u32.totalorder %s1530_s13, %s1900_s5 }
   0x5   :  { %p1536_p2 = pnand %p1534_p1, %p1531_p0 }
   0x7   :  { %1539 = shalt.err (!%p1536_p2)
}
   0x8   :  { %s1540_s18 = scalar_lea.vmem %s32_s10, 24576  ;;  %p1545_p4 = scmp.lt.s32.totalorder %s32_s10, %s32_s10 }
   0x9   :  { %p1541_p3 = scmp.ne.s32.totalorder %s32_s10, %s1540_s18  ;;  %p1546_p5 = scmp.lt.s32.totalorder %s1540_s18, %s1540_s18 }
   0xb   :  { %p1547_p6 = por %p1546_p5, %p1545_p4 }
   0xd   :  { %p1548_p7 = pnand %p1547_p6, %p1541_p3 }
   0xf   :  { %1551 = shalt.err (!%p1548_p7)
}
  0x10   :  { %s1579_s19 = smov 384   ;;  %s1580_s20 = smov 24  }
  0x11   :  { %37 = dma.hbm_to_vmem [thread:$0]  %s1900_s5, 24576, %s32_s10, [#allocation3], %s1579_s19, %s1579_s19, %s1580_s20  }
  0x12   :  { %1574 = dma.done.wait [#allocation3], 24576  }
  0x13   :  { %1575 = vsyncadd [#allocation3], 4294942720  ;;  %v1581_v0 = vmov 0.0   ;;  %v58_v1 = vld [vmem:[%s1898_s3 + $0x8] sm:$0xff]  ;;  %v57_v2 = vld [vmem:[%s1898_s3] sm:$0xff]  ;;  %vm61_vm0 = vcmask 64512  }
  0x14   :  { %129 = vmatprep.mubr.f32.mxu0 %v1581_v0  ;;  %200 = vmatprep.mubr.f32.mxu1 %v1581_v0  ;;  %v48_v3 = vld [vmem:[%s1896_s1] sm:$0xff]  ;;  %v50_v4 = vld [vmem:[%s1897_s2 + $0x8] sm:$0xff]  ;;  %v60_v9 = vld [vmem:[%s1898_s3 + $0x18] sm:$0xff]  ;;  %vm207_vm1 = vcmask 130048   ;;  %vm1583_vm2 = vmmov 0  }
  0x15   :  { %65 = vmatprep.subr.mxu0 %v58_v1  ;;  %v54_v5 = vld [vmem:[%s1897_s2 + $0x28] sm:$0xff]  ;;  %v49_v6 = vld [vmem:[%s1897_s2] sm:$0xff]  ;;  %136 = vmatprep.subr.mxu1 %v60_v9  ;;  %v59_v11 = vld [vmem:[%s1898_s3 + $0x10] sm:$0xff] }
  0x16   :  { %66 = vmatpush1.msra.mxu0 %v57_v2  ;;  %v1256_v7 = vpack.c.bf16 %v54_v5, %v50_v4  ;;  %v53_v8 = vld [vmem:[%s1897_s2 + $0x20] sm:$0xff]  ;;  %v52_v12 = vld [vmem:[%s1897_s2 + $0x18] sm:$0xff]  ;;  %v51_v15 = vld [vmem:[%s1897_s2 + $0x10] sm:$0xff]  ;;  %137 = vmatpush1.msra.mxu1 %v59_v11 }
  0x17   :  { %1093 = vmatmul.mubr.msk.f32.vlgmr.msra.gmra.mrb[0].mxu0 %vm61_vm0, %v48_v3  ;;  %v1258_v10 = vpack.c.bf16 %v53_v8, %v49_v6  ;;  %v56_v13 = vld [vmem:[%s1897_s2 + $0x38] sm:$0xff]  ;;  %v55_v16 = vld [vmem:[%s1897_s2 + $0x30] sm:$0xff]  ;;  %v384_v17 = vld [vmem:[#allocation2 + $0x8] sm:$0xff]  ;;  %1094 = vmatmul.mubr.msk.f32.vlgmr.msra.gmra.mrb[0].mxu1 %vm61_vm0, %v48_v3 }
  0x18   :  { %1257 = vmatprep.subr.bf16.mxu0 %v1256_v7  ;;  %275 = vmatprep.mubr.f32.mxu0 %v1581_v0  ;;  %v1260_v14 = vpack.c.bf16 %v56_v13, %v52_v12  ;;  %v1262_v18 = vpack.c.bf16 %v55_v16, %v51_v15  ;;  %v387_v19 = vld [vmem:[#allocation2 + $0x20] sm:$0xff]  ;;  %v386_v21 = vld [vmem:[#allocation2 + $0x18] sm:$0xff]  ;;  %v393_v24 = vld [vmem:[#allocation2 + $0x50] sm:$0xff] }
  0x19   :  { %1259 = vmatpush1.bf16.msra.mxu0 %v1258_v10  ;;  %v383_v20 = vld [vmem:[#allocation2] sm:$0xff]  ;;  %v1264_v22 = vpack.c.bf16 %v387_v19, %v384_v17  ;;  %v390_v23 = vld [vmem:[#allocation2 + $0x38] sm:$0xff]  ;;  %346 = vmatprep.mubr.f32.mxu1 %v1581_v0  ;;  %v389_v28 = vld [vmem:[#allocation2 + $0x30] sm:$0xff] }
  0x1a   :  { %1261 = vmatprep.subr.bf16.mxu1 %v1260_v14  ;;  %v47_v25 = vld [vmem:[%s1895_s0] sm:$0xff]  ;;  %v1266_v26 = vpack.c.bf16 %v386_v21, %v383_v20  ;;  %v1268_v27 = vpack.c.bf16 %v393_v24, %v390_v23  ;;  %v392_v29 = vld [vmem:[#allocation2 + $0x48] sm:$0xff]  ;;  %v398_v35 = vld [vmem:[#allocation2 + $0x78] sm:$0xff] }
  0x1b   :  { %1263 = vmatpush1.bf16.msra.mxu1 %v1262_v18  ;;  %1265 = vmatprep.subr.bf16.mxu0 %v1264_v22  ;;  %v396_v30 = vld [vmem:[#allocation2 + $0x68] sm:$0xff]  ;;  %v399_v31 = vld [vmem:[#allocation2 + $0x80] sm:$0xff]  ;;  %v1270_v32 = vpack.c.bf16 %v392_v29, %v389_v28  ;;  %v402_v36 = vld [vmem:[#allocation2 + $0x98] sm:$0xff] }
  0x1c   :  { %v1272_v33 = vpack.c.bf16 %v399_v31, %v396_v30  ;;  %v395_v34 = vld [vmem:[#allocation2 + $0x60] sm:$0xff]  ;;  %v405_v37 = vld [vmem:[#allocation2 + $0xb0] sm:$0xff]  ;;  %v436_v41 = vld [vmem:[#allocation2 + $0x1a8] sm:$0xff] }
  0x1d   :  { %v1274_v38 = vpack.c.bf16 %v398_v35, %v395_v34  ;;  %v401_v39 = vld [vmem:[#allocation2 + $0x90] sm:$0xff]  ;;  %v1276_v42 = vpack.c.bf16 %v405_v37, %v402_v36  ;;  %v404_v43 = vld [vmem:[#allocation2 + $0xa8] sm:$0xff]  ;;  %v411_v48 = vld [vmem:[#allocation2 + $0xe0] sm:$0xff] }
  0x1e   :  { %v433_v40 = vld [vmem:[#allocation2 + $0x190] sm:$0xff]  ;;  %v388_v46 = vld [vmem:[#allocation2 + $0x28] sm:$0xff]  ;;  %v439_v50 = vld [vmem:[#allocation2 + $0x1c0] sm:$0xff]  ;;  %v1278_v52 = vpack.c.bf16 %v404_v43, %v401_v39 }
  0x1f   :  { %1095 = vmatmul.mubr.msk.f32.vlgmr.msra.gmra.mrb[0].mxu0 %vm207_vm1, %v47_v25  ;;  %1096 = vmatmul.mubr.msk.f32.vlgmr.msra.gmra.mrb[0].mxu1 %vm207_vm1, %v47_v25  ;;  %v1392_v44 = vpack.c.bf16 %v436_v41, %v433_v40  ;;  %v385_v45 = vld [vmem:[#allocation2 + $0x10] sm:$0xff]  ;;  %v408_v47 = vld [vmem:[#allocation2 + $0xc8] sm:$0xff]  ;;  %v442_v51 = vld [vmem:[#allocation2 + $0x1d8] sm:$0xff] }
  0x20   :  { %1267 = vmatpush1.bf16.msra.mxu0 %v1266_v26  ;;  %v1394_v49 = vpack.c.bf16 %v388_v46, %v385_v45  ;;  %v407_v53 = vld [vmem:[#allocation2 + $0xc0] sm:$0xff]  ;;  %v1396_v54 = vpack.c.bf16 %v442_v51, %v439_v50  ;;  %v394_v56 = vld [vmem:[#allocation2 + $0x58] sm:$0xff]  ;;  %v1280_v57 = vpack.c.bf16 %v411_v48, %v408_v47  ;;  %v445_v60 = vld [vmem:[#allocation2 + $0x1f0] sm:$0xff] }
  0x21   :  { %1269 = vmatprep.subr.bf16.mxu0 %v1268_v27  ;;  %1393 = vmatprep.subr.bf16.mxu1 %v1392_v44  ;;  %v391_v55 = vld [vmem:[#allocation2 + $0x40] sm:$0xff]  ;;  %v410_v58 = vld [vmem:[#allocation2 + $0xd8] sm:$0xff]  ;;  %v448_v61 = vld [vmem:[#allocation2 + $0x208] sm:$0xff] }
  0x22   :  { %1395 = vmatpush3.bf16.msra.mxu1 %v1394_v49  ;;  %v1398_v59 = vpack.c.bf16 %v394_v56, %v391_v55  ;;  %v414_v62 = vld [vmem:[#allocation2 + $0xf8] sm:$0xff]  ;;  %v417_v63 = vld [vmem:[#allocation2 + $0x110] sm:$0xff]  ;;  %v1400_v1 = vpack.c.bf16 %v448_v61, %v445_v60  ;;  %v400_v3 = vld [vmem:[#allocation2 + $0x88] sm:$0xff]  ;;  %v1282_v4 = vpack.c.bf16 %v410_v58, %v407_v53 }
  0x23   :  { %1397 = vmatprep.subr.bf16.mxu1 %v1396_v54  ;;  %v397_v2 = vld [vmem:[#allocation2 + $0x70] sm:$0xff]  ;;  %v451_v7 = vld [vmem:[#allocation2 + $0x220] sm:$0xff]  ;;  %v454_v8 = vld [vmem:[#allocation2 + $0x238] sm:$0xff]  ;;  %v1284_v9 = vpack.c.bf16 %v417_v63, %v414_v62 }
  0x24   :  { %1271 = vmatpush1.bf16.msra.mxu0 %v1270_v32  ;;  %v413_v5 = vld [vmem:[#allocation2 + $0xf0] sm:$0xff]  ;;  %v1402_v6 = vpack.c.bf16 %v400_v3, %v397_v2  ;;  %v416_v10 = vld [vmem:[#allocation2 + $0x108] sm:$0xff]  ;;  %v1404_v11 = vpack.c.bf16 %v454_v8, %v451_v7  ;;  %v403_v12 = vld [vmem:[#allocation2 + $0xa0] sm:$0xff] }
  0x25   :  { %1273 = vmatprep.subr.bf16.mxu0 %v1272_v33  ;;  %v406_v13 = vld [vmem:[#allocation2 + $0xb8] sm:$0xff]  ;;  %v420_v14 = vld [vmem:[#allocation2 + $0x128] sm:$0xff]  ;;  %v423_v15 = vld [vmem:[#allocation2 + $0x140] sm:$0xff]  ;;  %v1286_v18 = vpack.c.bf16 %v416_v10, %v413_v5 }
  0x26   :  { %1399 = vmatpush3.bf16.msra.mxu1 %v1398_v59  ;;  %v457_v16 = vld [vmem:[#allocation2 + $0x250] sm:$0xff]  ;;  %v460_v17 = vld [vmem:[#allocation2 + $0x268] sm:$0xff]  ;;  %v419_v19 = vld [vmem:[#allocation2 + $0x120] sm:$0xff]  ;;  %v1406_v21 = vpack.c.bf16 %v406_v13, %v403_v12  ;;  %v1288_v22 = vpack.c.bf16 %v423_v15, %v420_v14 }
  0x27   :  { %1401 = vmatprep.subr.bf16.mxu1 %v1400_v1  ;;  %v422_v20 = vld [vmem:[#allocation2 + $0x138] sm:$0xff]  ;;  %v1408_v24 = vpack.c.bf16 %v460_v17, %v457_v16  ;;  %v409_v25 = vld [vmem:[#allocation2 + $0xd0] sm:$0xff]  ;;  %v412_v26 = vld [vmem:[#allocation2 + $0xe8] sm:$0xff] }
  0x28   :  { %1275 = vmatpush1.bf16.msra.mxu0 %v1274_v38  ;;  %v426_v23 = vld [vmem:[#allocation2 + $0x158] sm:$0xff]  ;;  %v429_v27 = vld [vmem:[#allocation2 + $0x170] sm:$0xff]  ;;  %v463_v28 = vld [vmem:[#allocation2 + $0x280] sm:$0xff]  ;;  %v1290_v30 = vpack.c.bf16 %v422_v20, %v419_v19  ;;  %v1410_v33 = vpack.c.bf16 %v412_v26, %v409_v25 }
  0x29   :  { %1277 = vmatprep.subr.bf16.mxu0 %v1276_v42  ;;  %v466_v29 = vld [vmem:[#allocation2 + $0x298] sm:$0xff]  ;;  %v425_v31 = vld [vmem:[#allocation2 + $0x150] sm:$0xff]  ;;  %v428_v32 = vld [vmem:[#allocation2 + $0x168] sm:$0xff]  ;;  %v1292_v34 = vpack.c.bf16 %v429_v27, %v426_v23 }
  0x2a   :  { %1403 = vmatpush3.bf16.msra.mxu1 %v1402_v6  ;;  %v432_v35 = vld [vmem:[#allocation2 + $0x188] sm:$0xff]  ;;  %v1412_v36 = vpack.c.bf16 %v466_v29, %v463_v28  ;;  %v415_v37 = vld [vmem:[#allocation2 + $0x100] sm:$0xff]  ;;  %v418_v38 = vld [vmem:[#allocation2 + $0x118] sm:$0xff]  ;;  %v1294_v42 = vpack.c.bf16 %v428_v32, %v425_v31 }
  0x2b   :  { %1405 = vmatprep.subr.bf16.mxu1 %v1404_v11  ;;  %v435_v39 = vld [vmem:[#allocation2 + $0x1a0] sm:$0xff]  ;;  %v469_v40 = vld [vmem:[#allocation2 + $0x2b0] sm:$0xff]  ;;  %v472_v41 = vld [vmem:[#allocation2 + $0x2c8] sm:$0xff]  ;;  %v1414_v44 = vpack.c.bf16 %v418_v38, %v415_v37 }
  0x2c   :  { %1279 = vmatpush1.bf16.msra.mxu0 %v1278_v52  ;;  %v431_v43 = vld [vmem:[#allocation2 + $0x180] sm:$0xff]  ;;  %v1296_v45 = vpack.c.bf16 %v435_v39, %v432_v35  ;;  %v434_v46 = vld [vmem:[#allocation2 + $0x198] sm:$0xff]  ;;  %v1416_v47 = vpack.c.bf16 %v472_v41, %v469_v40  ;;  %v421_v48 = vld [vmem:[#allocation2 + $0x130] sm:$0xff] }
  0x2d   :  { %1281 = vmatprep.subr.bf16.mxu0 %v1280_v57  ;;  %v424_v49 = vld [vmem:[#allocation2 + $0x148] sm:$0xff]  ;;  %v438_v50 = vld [vmem:[#allocation2 + $0x1b8] sm:$0xff]  ;;  %v441_v51 = vld [vmem:[#allocation2 + $0x1d0] sm:$0xff]  ;;  %v1298_v52 = vpack.c.bf16 %v434_v46, %v431_v43  ;;  %v355_v43 = vlaneseq }
  0x2e   :  { %1407 = vmatpush3.bf16.msra.mxu1 %v1406_v21  ;;  %v1418_v53 = vpack.c.bf16 %v424_v49, %v421_v48  ;;  %v1300_v54 = vpack.c.bf16 %v441_v51, %v438_v50  ;;  %v437_v55 = vld [vmem:[#allocation2 + $0x1b0] sm:$0xff]  ;;  %v440_v56 = vld [vmem:[#allocation2 + $0x1c8] sm:$0xff]  ;;  %v447_v58 = vld [vmem:[#allocation2 + $0x200] sm:$0xff] }
  0x2f   :  { %1409 = vmatprep.subr.bf16.mxu1 %v1408_v24  ;;  %v444_v57 = vld [vmem:[#allocation2 + $0x1e8] sm:$0xff]  ;;  %v1302_v59 = vpack.c.bf16 %v440_v56, %v437_v55  ;;  %v443_v61 = vld [vmem:[#allocation2 + $0x1e0] sm:$0xff]  ;;  %v446_v62 = vld [vmem:[#allocation2 + $0x1f8] sm:$0xff] }
  0x30   :  { %1283 = vmatpush1.bf16.msra.mxu0 %v1282_v4  ;;  %v1304_v60 = vpack.c.bf16 %v447_v58, %v444_v57  ;;  %v450_v63 = vld [vmem:[#allocation2 + $0x218] sm:$0xff]  ;;  %v453_v1 = vld [vmem:[#allocation2 + $0x230] sm:$0xff]  ;;  %v1306_v2 = vpack.c.bf16 %v446_v62, %v443_v61  ;;  %v452_v5 = vld [vmem:[#allocation2 + $0x228] sm:$0xff] }
  0x31   :  { %1285 = vmatprep.subr.bf16.mxu0 %v1284_v9  ;;  %v1308_v3 = vpack.c.bf16 %v453_v1, %v450_v63  ;;  %v449_v4 = vld [vmem:[#allocation2 + $0x210] sm:$0xff]  ;;  %v456_v6 = vld [vmem:[#allocation2 + $0x248] sm:$0xff]  ;;  %v459_v7 = vld [vmem:[#allocation2 + $0x260] sm:$0xff] }
  0x32   :  { %1411 = vmatpush3.bf16.msra.mxu1 %v1410_v33  ;;  %v1310_v8 = vpack.c.bf16 %v452_v5, %v449_v4  ;;  %v1312_v9 = vpack.c.bf16 %v459_v7, %v456_v6  ;;  %v455_v10 = vld [vmem:[#allocation2 + $0x240] sm:$0xff]  ;;  %v458_v11 = vld [vmem:[#allocation2 + $0x258] sm:$0xff]  ;;  %v465_v13 = vld [vmem:[#allocation2 + $0x290] sm:$0xff] }
  0x33   :  { %1413 = vmatprep.subr.bf16.mxu1 %v1412_v36  ;;  %v462_v12 = vld [vmem:[#allocation2 + $0x278] sm:$0xff]  ;;  %v1314_v14 = vpack.c.bf16 %v458_v11, %v455_v10  ;;  %v461_v16 = vld [vmem:[#allocation2 + $0x270] sm:$0xff]  ;;  %v464_v17 = vld [vmem:[#allocation2 + $0x288] sm:$0xff] }
  0x34   :  { %1287 = vmatpush1.bf16.msra.mxu0 %v1286_v18  ;;  %v1316_v15 = vpack.c.bf16 %v465_v13, %v462_v12  ;;  %v468_v18 = vld [vmem:[#allocation2 + $0x2a8] sm:$0xff]  ;;  %v471_v19 = vld [vmem:[#allocation2 + $0x2c0] sm:$0xff]  ;;  %v1318_v20 = vpack.c.bf16 %v464_v17, %v461_v16  ;;  %v470_v23 = vld [vmem:[#allocation2 + $0x2b8] sm:$0xff] }
  0x35   :  { %1289 = vmatprep.subr.bf16.mxu0 %v1288_v22  ;;  %v1320_v21 = vpack.c.bf16 %v471_v19, %v468_v18  ;;  %v467_v22 = vld [vmem:[#allocation2 + $0x2a0] sm:$0xff]  ;;  %v474_v25 = vld [vmem:[#allocation2 + $0x2d8] sm:$0xff]  ;;  %v477_v26 = vld [vmem:[#allocation2 + $0x2f0] sm:$0xff] }
  0x36   :  { %1415 = vmatpush3.bf16.msra.mxu1 %v1414_v44  ;;  %v1322_v24 = vpack.c.bf16 %v470_v23, %v467_v22  ;;  %v475_v27 = vld [vmem:[#allocation2 + $0x2e0] sm:$0xff]  ;;  %v1324_v28 = vpack.c.bf16 %v477_v26, %v474_v25  ;;  %v478_v29 = vld [vmem:[#allocation2 + $0x2f8] sm:$0xff]  ;;  %v476_v31 = vld [vmem:[#allocation2 + $0x2e8] sm:$0xff]  ;;  %v1695_v44 = vshrl.u32 %v355_v43, 7 }
  0x37   :  { %1417 = vmatprep.subr.bf16.mxu1 %v1416_v47  ;;  %v1420_v32 = vpack.c.bf16 %v478_v29, %v475_v27  ;;  %v430_v35 = vld [vmem:[#allocation2 + $0x178] sm:$0xff]  ;;  %v480_v37 = vld [vmem:[#allocation2 + $0x308] sm:$0xff]  ;;  %v483_v38 = vld [vmem:[#allocation2 + $0x320] sm:$0xff] }
  0x38   :  { %1291 = vmatpush1.bf16.msra.mxu0 %v1290_v30  ;;  %v473_v30 = vld [vmem:[#allocation2 + $0x2d0] sm:$0xff]  ;;  %v1328_v40 = vpack.c.bf16 %v483_v38, %v480_v37  ;;  %v532_v41 = vld [vmem:[#allocation2 + $0x4a8] sm:$0xff]  ;;  %v1701_v46 = vld [vmem:[%s1899_s4] sm:$0xf]  ;;  %v361_v47 = vsub.s32 1, %v1695_v44  ;;  %v369_v49 = vsub.s32 3, %v1695_v44 }
  0x39   :  { %1293 = vmatprep.subr.bf16.mxu0 %v1292_v34  ;;  %v1326_v33 = vpack.c.bf16 %v476_v31, %v473_v30  ;;  %v427_v34 = vld [vmem:[#allocation2 + $0x160] sm:$0xff]  ;;  %v529_v39 = vld [vmem:[#allocation2 + $0x490] sm:$0xff]  ;;  %v484_v57 = vld [vmem:[#allocation2 + $0x328] sm:$0xff] }
  0x3a   :  { %1419 = vmatpush3.bf16.msra.mxu1 %v1418_v53  ;;  %v1422_v36 = vpack.c.bf16 %v430_v35, %v427_v34  ;;  %v362_v50 = vrot.slane %v1701_v46, %v361_v47  ;;  %v482_v53 = vld [vmem:[#allocation2 + $0x318] sm:$0xff]  ;;  %v481_v56 = vld [vmem:[#allocation2 + $0x310] sm:$0xff]  ;;  %v535_v62 = vld [vmem:[#allocation2 + $0x4c0] sm:$0xff] }
  0x3b   :  { %1421 = vmatprep.subr.bf16.mxu1 %v1420_v32  ;;  %v486_v58 = vld [vmem:[#allocation2 + $0x338] sm:$0xff]  ;;  %v489_v61 = vld [vmem:[#allocation2 + $0x350] sm:$0xff]  ;;  %v1426_v4 = vpack.c.bf16 %v484_v57, %v481_v56  ;;  %v488_v6 = vld [vmem:[#allocation2 + $0x348] sm:$0xff] }
  0x3c   :  { %1295 = vmatpush1.bf16.msra.mxu0 %v1294_v42  ;;  %v1424_v42 = vpack.c.bf16 %v532_v41, %v529_v39  ;;  %v538_v63 = vld [vmem:[#allocation2 + $0x4d8] sm:$0xff]  ;;  %v485_v5 = vld [vmem:[#allocation2 + $0x330] sm:$0xff]  ;;  %v487_v11 = vld [vmem:[#allocation2 + $0x340] sm:$0xff] }
  0x3d   :  { %1297 = vmatprep.subr.bf16.mxu0 %v1296_v45  ;;  %v357_v45 = vsub.s32 0, %v1695_v44  ;;  %v1428_v10 = vpack.c.bf16 %v538_v63, %v535_v62  ;;  %v490_v12 = vld [vmem:[#allocation2 + $0x358] sm:$0xff]  ;;  %v492_v13 = vld [vmem:[#allocation2 + $0x368] sm:$0xff]  ;;  %v541_v16 = vld [vmem:[#allocation2 + $0x4f0] sm:$0xff]  ;;  %v1334_v19 = vpack.c.bf16 %v488_v6, %v485_v5 }
  0x3e   :  { %1423 = vmatpush3.bf16.msra.mxu1 %v1422_v36  ;;  %v544_v17 = vld [vmem:[#allocation2 + $0x508] sm:$0xff]  ;;  %v494_v22 = vld [vmem:[#allocation2 + $0x378] sm:$0xff]  ;;  %v493_v25 = vld [vmem:[#allocation2 + $0x370] sm:$0xff] }
  0x3f   :  { %1425 = vmatprep.subr.bf16.mxu1 %v1424_v42  ;;  %v358_v48 = vrot.slane %v1701_v46, %v357_v45  ;;  %v496_v26 = vld [vmem:[#allocation2 + $0x388] sm:$0xff]  ;;  %v498_v27 = vld [vmem:[#allocation2 + $0x398] sm:$0xff]  ;;  %v547_v29 = vld [vmem:[#allocation2 + $0x520] sm:$0xff] }
  0x40   :  { %1299 = vmatpush1.bf16.msra.mxu0 %v1298_v52  ;;  %v479_v52 = vld [vmem:[#allocation2 + $0x300] sm:$0xff]  ;;  %v550_v30 = vld [vmem:[#allocation2 + $0x538] sm:$0xff]  ;;  %v1434_v32 = vpack.c.bf16 %v496_v26, %v493_v25  ;;  %v500_v34 = vld [vmem:[#allocation2 + $0x3a8] sm:$0xff] }
  0x41   :  { %1301 = vmatprep.subr.bf16.mxu0 %v1300_v54  ;;  %v1436_v36 = vpack.c.bf16 %v550_v30, %v547_v29  ;;  %v499_v37 = vld [vmem:[#allocation2 + $0x3a0] sm:$0xff]  ;;  %v502_v38 = vld [vmem:[#allocation2 + $0x3b8] sm:$0xff]  ;;  %v504_v39 = vld [vmem:[#allocation2 + $0x3c8] sm:$0xff] }
  0x42   :  { %v553_v41 = vld [vmem:[#allocation2 + $0x550] sm:$0xff]  ;;  %v556_v42 = vld [vmem:[#allocation2 + $0x568] sm:$0xff]  ;;  %v559_v57 = vld [vmem:[#allocation2 + $0x580] sm:$0xff] }
  0x43   :  { %v513_v56 = vld [vmem:[#allocation2 + $0x410] sm:$0xff]  ;;  %v512_v62 = vld [vmem:[#allocation2 + $0x408] sm:$0xff]  ;;  %v519_v6 = vld [vmem:[#allocation2 + $0x440] sm:$0xff] }
  0x44   :  { %1303 = vmatpush1.bf16.msra.mxu0 %v1302_v59  ;;  %v370_v59 = vrot.slane %v1701_v46, %v369_v49  ;;  %v503_v49 = vld [vmem:[#allocation2 + $0x3c0] sm:$0xff]  ;;  %v516_v5 = vld [vmem:[#allocation2 + $0x428] sm:$0xff]  ;;  %v521_v25 = vld [vmem:[#allocation2 + $0x450] sm:$0xff] }
  0x45   :  { %1305 = vmatprep.subr.bf16.mxu0 %v1304_v60  ;;  %v523_v29 = vld [vmem:[#allocation2 + $0x460] sm:$0xff]  ;;  %v526_v30 = vld [vmem:[#allocation2 + $0x478] sm:$0xff] }
  0x48   :  { %1307 = vmatpush1.bf16.msra.mxu0 %v1306_v2 }
  0x49   :  { %1309 = vmatprep.subr.bf16.mxu0 %v1308_v3  ;;  %v1330_v3 = vpack.c.bf16 %v482_v53, %v479_v52  ;;  %v1440_v52 = vpack.c.bf16 %v556_v42, %v553_v41  ;;  %v505_v53 = vld [vmem:[#allocation2 + $0x3d0] sm:$0xff] }
  0x4c   :  { %1311 = vmatpush1.bf16.msra.mxu0 %v1310_v8 }
  0x4d   :  { %1313 = vmatprep.subr.bf16.mxu0 %v1312_v9  ;;  %v1332_v9 = vpack.c.bf16 %v489_v61, %v486_v58  ;;  %v562_v58 = vld [vmem:[#allocation2 + $0x598] sm:$0xff]  ;;  %v509_v61 = vld [vmem:[#allocation2 + $0x3f0] sm:$0xff] }
  0x50   :  { %1315 = vmatpush1.bf16.msra.mxu0 %v1314_v14 }
  0x51   :  { %1317 = vmatprep.subr.bf16.mxu0 %v1316_v15  ;;  %v495_v15 = vld [vmem:[#allocation2 + $0x380] sm:$0xff] }
  0x52   :  { %v1336_v23 = vpack.c.bf16 %v495_v15, %v492_v13  ;;  %v518_v13 = vld [vmem:[#allocation2 + $0x438] sm:$0xff] }
  0x54   :  { %1319 = vmatpush1.bf16.msra.mxu0 %v1318_v20  ;;  %v1430_v20 = vpack.c.bf16 %v490_v12, %v487_v11  ;;  %v515_v12 = vld [vmem:[#allocation2 + $0x420] sm:$0xff] }
  0x55   :  { %1321 = vmatprep.subr.bf16.mxu0 %v1320_v21  ;;  %v491_v21 = vld [vmem:[#allocation2 + $0x360] sm:$0xff] }
  0x56   :  { %v1338_v31 = vpack.c.bf16 %v494_v22, %v491_v21  ;;  %v574_v21 = vld [vmem:[#allocation2 + $0x5f8] sm:$0xff] }
  0x58   :  { %1323 = vmatpush1.bf16.msra.mxu0 %v1322_v24  ;;  %v1432_v24 = vpack.c.bf16 %v544_v17, %v541_v16  ;;  %v517_v16 = vld [vmem:[#allocation2 + $0x430] sm:$0xff]  ;;  %v520_v17 = vld [vmem:[#allocation2 + $0x448] sm:$0xff] }
  0x59   :  { %1325 = vmatprep.subr.bf16.mxu0 %v1324_v28  ;;  %v501_v28 = vld [vmem:[#allocation2 + $0x3b0] sm:$0xff] }
  0x5a   :  { %v1340_v35 = vpack.c.bf16 %v501_v28, %v498_v27  ;;  %v524_v28 = vld [vmem:[#allocation2 + $0x468] sm:$0xff] }
  0x5c   :  { %1327 = vmatpush1.bf16.msra.mxu0 %v1326_v33  ;;  %v497_v33 = vld [vmem:[#allocation2 + $0x390] sm:$0xff] }
  0x5d   :  { %1329 = vmatprep.subr.bf16.mxu0 %v1328_v40  ;;  %v507_v40 = vld [vmem:[#allocation2 + $0x3e0] sm:$0xff]  ;;  %v1342_v43 = vpack.c.bf16 %v500_v34, %v497_v33  ;;  %v1454_v34 = vpack.c.bf16 %v526_v30, %v523_v29  ;;  %v895_v30 = vld [vmem:[%s1902_s7 + $0x90] sm:$0xff] }
  0xf2   :  { %v277_v51 = vpop.f32.mrb[0].mxu0  ;;  %v1712_v1 = vpop.f32.mrb[0].mxu1 }
  0xf3   :  { %v375_v54 = vadd.f32 %v358_v48, %v277_v51  ;;  %v279_v55 = vpop.f32.mrb[1].mxu0  ;;  %v350_v7 = vpop.f32.mrb[1].mxu1  ;;  %v1438_v48 = vpack.c.bf16 %v502_v38, %v499_v37  ;;  %v1344_v51 = vpack.c.bf16 %v507_v40, %v504_v39  ;;  %v530_v37 = vld [vmem:[#allocation2 + $0x498] sm:$0xff]  ;;  %v537_v39 = vld [vmem:[#allocation2 + $0x4d0] sm:$0xff] }
  0xf4   :  { %v376_v60 = vadd.f32 %v362_v50, %v279_v55  ;;  %v378_v14 = vadd.f32 %v370_v59, %v350_v7  ;;  %v506_v50 = vld [vmem:[#allocation2 + $0x3d8] sm:$0xff]  ;;  %v565_v7 = vld [vmem:[#allocation2 + $0x5b0] sm:$0xff] }
  0xf5   :  { %v379_v8 = vmax.f32 %v375_v54, 0.0  ;;  %v508_v54 = vld [vmem:[#allocation2 + $0x3e8] sm:$0xff]  ;;  %v510_v55 = vld [vmem:[#allocation2 + $0x3f8] sm:$0xff]  ;;  %v1346_v59 = vpack.c.bf16 %v506_v50, %v503_v49  ;;  %v543_v49 = vld [vmem:[#allocation2 + $0x500] sm:$0xff] }
  0xf6   :  { %v380_v2 = vmax.f32 %v376_v60, 0.0  ;;  %v382_v18 = vmax.f32 %v378_v14, 0.0  ;;  %v1442_v60 = vpack.c.bf16 %v508_v54, %v505_v53  ;;  %v1348_v63 = vpack.c.bf16 %v513_v56, %v510_v55  ;;  %v534_v38 = vld [vmem:[#allocation2 + $0x4b8] sm:$0xff]  ;;  %v549_v55 = vld [vmem:[#allocation2 + $0x530] sm:$0xff] }
  0xf7   :  { %v1352_v14 = vpack.c.bf16 %v519_v6, %v516_v5  ;;  %v1364_v42 = vpack.c.bf16 %v537_v39, %v534_v38  ;;  %v542_v53 = vld [vmem:[#allocation2 + $0x4f8] sm:$0xff]  ;;  %v561_v5 = vld [vmem:[#allocation2 + $0x590] sm:$0xff]  ;;  %v881_v38 = vld [vmem:[%s1902_s7 + $0x20] sm:$0xff] }
  0xf8   :  { %656 = vmatprep.mubr.f32.mxu0 %v380_v2  ;;  %798 = vmatprep.mubr.f32.mxu1 %v380_v2  ;;  %v1444_v2 = vpack.c.bf16 %v562_v58, %v559_v57  ;;  %v546_v54 = vld [vmem:[#allocation2 + $0x518] sm:$0xff]  ;;  %v545_v58 = vld [vmem:[#allocation2 + $0x510] sm:$0xff]  ;;  %v882_v39 = vld [vmem:[%s1902_s7 + $0x28] sm:$0xff] }
  0xf9   :  { %657 = vmatmul.mubr.f32.vlgmr.msra.gmra.mrb[2].mxu0 %v379_v8  ;;  %799 = vmatmul.mubr.f32.vlgmr.msra.gmra.mrb[2].mxu1 %v379_v8  ;;  %v568_v8 = vld [vmem:[#allocation2 + $0x5c8] sm:$0xff]  ;;  %v1372_v57 = vpack.c.bf16 %v549_v55, %v546_v54  ;;  %v903_v55 = vld [vmem:[%s1902_s7 + $0xd0] sm:$0xff] }
  0xfa   :  { %1331 = vmatpush1.bf16.msra.mxu0 %v1330_v3  ;;  %1427 = vmatpush3.bf16.msra.mxu1 %v1426_v4  ;;  %v511_v3 = vld [vmem:[#allocation2 + $0x400] sm:$0xff]  ;;  %v514_v4 = vld [vmem:[#allocation2 + $0x418] sm:$0xff]  ;;  %v1448_v15 = vpack.c.bf16 %v568_v8, %v565_v7  ;;  %v557_v8 = vld [vmem:[#allocation2 + $0x570] sm:$0xff] }
  0xfb   :  { %1333 = vmatprep.subr.bf16.mxu0 %v1332_v9  ;;  %1429 = vmatprep.subr.bf16.mxu1 %v1428_v10  ;;  %v365_v9 = vsub.s32 2, %v1695_v44  ;;  %v1350_v10 = vpack.c.bf16 %v512_v62, %v509_v61  ;;  %v1446_v11 = vpack.c.bf16 %v514_v4, %v511_v3  ;;  %v555_v61 = vld [vmem:[#allocation2 + $0x560] sm:$0xff]  ;;  %v554_v3 = vld [vmem:[#allocation2 + $0x558] sm:$0xff]  ;;  %v886_v54 = vld [vmem:[%s1902_s7 + $0x48] sm:$0xff] }
  0xfc   :  { %868 = vmatprep.mubr.f32.mxu1 %v382_v18  ;;  %727 = vmatprep.mubr.f32.mxu0 %v382_v18  ;;  %v522_v18 = vld [vmem:[#allocation2 + $0x458] sm:$0xff]  ;;  %v911_v44 = vld [vmem:[%s1902_s7 + $0x110] sm:$0xff] }
  0xfd   :  { %v366_v22 = vrot.slane %v1701_v46, %v365_v9  ;;  %v1358_v46 = vpack.c.bf16 %v524_v28, %v521_v25  ;;  %v558_v4 = vld [vmem:[#allocation2 + $0x578] sm:$0xff]  ;;  %v894_v25 = vld [vmem:[%s1902_s7 + $0x88] sm:$0xff] }
  0xfe   :  { %1335 = vmatpush1.bf16.msra.mxu0 %v1334_v19  ;;  %1431 = vmatpush3.bf16.msra.mxu1 %v1430_v20  ;;  %v525_v19 = vld [vmem:[#allocation2 + $0x470] sm:$0xff]  ;;  %v571_v20 = vld [vmem:[#allocation2 + $0x5e0] sm:$0xff]  ;;  %v1380_v7 = vpack.c.bf16 %v561_v5, %v558_v4  ;;  %v878_v28 = vld [vmem:[%s1902_s7 + $0x8] sm:$0xff] }
  0xff   :  { %1337 = vmatprep.subr.bf16.mxu0 %v1336_v23  ;;  %1433 = vmatprep.subr.bf16.mxu1 %v1432_v24  ;;  %v1354_v23 = vpack.c.bf16 %v518_v13, %v515_v12  ;;  %v1450_v24 = vpack.c.bf16 %v520_v17, %v517_v16  ;;  %v1356_v26 = vpack.c.bf16 %v525_v19, %v522_v18  ;;  %v567_v12 = vld [vmem:[#allocation2 + $0x5c0] sm:$0xff]  ;;  %v566_v16 = vld [vmem:[#allocation2 + $0x5b8] sm:$0xff]  ;;  %v573_v18 = vld [vmem:[#allocation2 + $0x5f0] sm:$0xff] }
 0x100   :  { %v1452_v27 = vpack.c.bf16 %v574_v21, %v571_v20  ;;  %v1719_v33 = vadd.f32 %v366_v22, %v1712_v1  ;;  %v533_v1 = vld [vmem:[#allocation2 + $0x4b0] sm:$0xff]  ;;  %v570_v17 = vld [vmem:[#allocation2 + $0x5d8] sm:$0xff]  ;;  %v572_v22 = vld [vmem:[#allocation2 + $0x5e8] sm:$0xff] }
 0x101   :  { %v1388_v20 = vpack.c.bf16 %v573_v18, %v570_v17  ;;  %v569_v21 = vld [vmem:[#allocation2 + $0x5d0] sm:$0xff]  ;;  %v890_v4 = vld [vmem:[%s1902_s7 + $0x68] sm:$0xff]  ;;  %v575_v17 = vld [vmem:[%s1901_s6] sm:$0x7] }
 0x102   :  { %1339 = vmatpush1.bf16.msra.mxu0 %v1338_v31  ;;  %1435 = vmatpush3.bf16.msra.mxu1 %v1434_v32  ;;  %v528_v31 = vld [vmem:[#allocation2 + $0x488] sm:$0xff]  ;;  %v531_v32 = vld [vmem:[#allocation2 + $0x4a0] sm:$0xff]  ;;  %v381_v40 = vmax.f32 %v1719_v33, 0.0  ;;  %v588_v18 = vrot.slane %v575_v17, %v365_v9 }
 0x103   :  { %1341 = vmatprep.subr.bf16.mxu0 %v1340_v35  ;;  %1437 = vmatprep.subr.bf16.mxu1 %v1436_v36  ;;  %v1360_v35 = vpack.c.bf16 %v531_v32, %v528_v31  ;;  %v527_v36 = vld [vmem:[#allocation2 + $0x480] sm:$0xff]  ;;  %v896_v31 = vld [vmem:[%s1902_s7 + $0x98] sm:$0xff]  ;;  %v879_v32 = vld [vmem:[%s1902_s7 + $0x10] sm:$0xff] }
 0x104   :  { %v1362_v41 = vpack.c.bf16 %v530_v37, %v527_v36  ;;  %v1460_v33 = vpack.c.bf16 %v896_v31, %v895_v30  ;;  %v910_v9 = vld [vmem:[%s1902_s7 + $0x108] sm:$0xff] }
 0x106   :  { %1343 = vmatpush1.bf16.msra.mxu0 %v1342_v43  ;;  %1439 = vmatpush3.bf16.msra.mxu1 %v1438_v48  ;;  %v536_v43 = vld [vmem:[#allocation2 + $0x4c8] sm:$0xff] }
 0x107   :  { %1345 = vmatprep.subr.bf16.mxu0 %v1344_v51  ;;  %1441 = vmatprep.subr.bf16.mxu1 %v1440_v52  ;;  %v540_v48 = vld [vmem:[#allocation2 + $0x4e8] sm:$0xff]  ;;  %v1366_v50 = vpack.c.bf16 %v536_v43, %v533_v1  ;;  %v539_v52 = vld [vmem:[#allocation2 + $0x4e0] sm:$0xff]  ;;  %v883_v43 = vld [vmem:[%s1902_s7 + $0x30] sm:$0xff] }
 0x108   :  { %v1368_v51 = vpack.c.bf16 %v543_v49, %v540_v48  ;;  %v1370_v56 = vpack.c.bf16 %v542_v53, %v539_v52  ;;  %v884_v48 = vld [vmem:[%s1902_s7 + $0x38] sm:$0xff]  ;;  %v901_v49 = vld [vmem:[%s1902_s7 + $0xc0] sm:$0xff] }
 0x109   :  { %v885_v53 = vld [vmem:[%s1902_s7 + $0x40] sm:$0xff] }
 0x10a   :  { %1347 = vmatpush1.bf16.msra.mxu0 %v1346_v59  ;;  %1443 = vmatpush3.bf16.msra.mxu1 %v1442_v60  ;;  %v548_v59 = vld [vmem:[#allocation2 + $0x528] sm:$0xff] }
 0x10b   :  { %1349 = vmatprep.subr.bf16.mxu0 %v1348_v63  ;;  %1445 = vmatprep.subr.bf16.mxu1 %v1444_v2  ;;  %v552_v60 = vld [vmem:[#allocation2 + $0x548] sm:$0xff]  ;;  %v1374_v62 = vpack.c.bf16 %v548_v59, %v545_v58  ;;  %v551_v2 = vld [vmem:[#allocation2 + $0x540] sm:$0xff]  ;;  %v887_v59 = vld [vmem:[%s1902_s7 + $0x50] sm:$0xff] }
 0x10c   :  { %v1376_v63 = vpack.c.bf16 %v555_v61, %v552_v60  ;;  %v1378_v6 = vpack.c.bf16 %v554_v3, %v551_v2  ;;  %v888_v60 = vld [vmem:[%s1902_s7 + $0x58] sm:$0xff]  ;;  %v905_v61 = vld [vmem:[%s1902_s7 + $0xe0] sm:$0xff] }
 0x10d   :  { %v889_v3 = vld [vmem:[%s1902_s7 + $0x60] sm:$0xff] }
 0x10e   :  { %1351 = vmatpush1.bf16.msra.mxu0 %v1350_v10  ;;  %1447 = vmatpush3.bf16.msra.mxu1 %v1446_v11  ;;  %v560_v10 = vld [vmem:[#allocation2 + $0x588] sm:$0xff]  ;;  %v1482_v5 = vpack.c.bf16 %v890_v4, %v889_v3 }
 0x10f   :  { %1353 = vmatprep.subr.bf16.mxu0 %v1352_v14  ;;  %1449 = vmatprep.subr.bf16.mxu1 %v1448_v15  ;;  %v564_v11 = vld [vmem:[#allocation2 + $0x5a8] sm:$0xff]  ;;  %v1382_v13 = vpack.c.bf16 %v560_v10, %v557_v8  ;;  %v563_v15 = vld [vmem:[#allocation2 + $0x5a0] sm:$0xff]  ;;  %v891_v10 = vld [vmem:[%s1902_s7 + $0x70] sm:$0xff] }
 0x110   :  { %v1384_v14 = vpack.c.bf16 %v567_v12, %v564_v11  ;;  %v1386_v19 = vpack.c.bf16 %v566_v16, %v563_v15  ;;  %v892_v11 = vld [vmem:[%s1902_s7 + $0x78] sm:$0xff] }
 0x111   :  { %v1486_v12 = vpack.c.bf16 %v892_v11, %v891_v10 }
 0x112   :  { %1355 = vmatpush1.bf16.msra.mxu0 %v1354_v23  ;;  %1451 = vmatpush3.bf16.msra.mxu1 %v1450_v24  ;;  %v1390_v23 = vpack.c.bf16 %v572_v22, %v569_v21  ;;  %v893_v24 = vld [vmem:[%s1902_s7 + $0x80] sm:$0xff] }
 0x113   :  { %1357 = vmatprep.subr.bf16.mxu0 %v1356_v26  ;;  %1453 = vmatprep.subr.bf16.mxu1 %v1452_v27  ;;  %v1456_v26 = vpack.c.bf16 %v894_v25, %v893_v24  ;;  %v877_v27 = vld [vmem:[%s1902_s7] sm:$0xff]  ;;  %v580_v24 = vrot.slane %v575_v17, %v357_v45  ;;  %v584_v25 = vrot.slane %v575_v17, %v361_v47  ;;  %v912_v45 = vld [vmem:[%s1902_s7 + $0x118] sm:$0xff] }
 0x114   :  { %v1458_v29 = vpack.c.bf16 %v878_v28, %v877_v27  ;;  %v1492_v47 = vpack.c.bf16 %v912_v45, %v911_v44 }
 0x116   :  { %1359 = vmatpush1.bf16.msra.mxu0 %v1358_v46  ;;  %1455 = vmatpush3.bf16.msra.mxu1 %v1454_v34  ;;  %v880_v46 = vld [vmem:[%s1902_s7 + $0x18] sm:$0xff]  ;;  %v897_v34 = vld [vmem:[%s1902_s7 + $0xa0] sm:$0xff] }
 0x117   :  { %1361 = vmatprep.subr.bf16.mxu0 %v1360_v35  ;;  %1457 = vmatprep.subr.bf16.mxu1 %v1456_v26  ;;  %v898_v35 = vld [vmem:[%s1902_s7 + $0xa8] sm:$0xff]  ;;  %v1462_v36 = vpack.c.bf16 %v880_v46, %v879_v32  ;;  %v913_v46 = vld [vmem:[%s1902_s7 + $0x120] sm:$0xff] }
 0x118   :  { %v1464_v37 = vpack.c.bf16 %v898_v35, %v897_v34  ;;  %v914_v34 = vld [vmem:[%s1902_s7 + $0x128] sm:$0xff] }
 0x119   :  { %869 = vmatmul.mubr.f32.vlgmr.msra.gmra.mrb[4].mxu1 %v381_v40  ;;  %v1495_v35 = vpack.c.bf16 %v914_v34, %v913_v46 }
 0x11a   :  { %1363 = vmatpush1.bf16.msra.mxu0 %v1362_v41  ;;  %1459 = vmatpush3.bf16.msra.mxu1 %v1458_v29  ;;  %v900_v41 = vld [vmem:[%s1902_s7 + $0xb8] sm:$0xff]  ;;  %v909_v29 = vld [vmem:[%s1902_s7 + $0x100] sm:$0xff] }
 0x11b   :  { %1365 = vmatprep.subr.bf16.mxu0 %v1364_v42  ;;  %1461 = vmatprep.subr.bf16.mxu1 %v1460_v33  ;;  %v1466_v42 = vpack.c.bf16 %v882_v39, %v881_v38  ;;  %v1489_v32 = vpack.c.bf16 %v910_v9, %v909_v29  ;;  %v917_v38 = vld [vmem:[%s1902_s7 + $0x140] sm:$0xff]  ;;  %v918_v39 = vld [vmem:[%s1902_s7 + $0x148] sm:$0xff] }
 0x11e   :  { %1367 = vmatpush1.bf16.msra.mxu0 %v1366_v50  ;;  %1463 = vmatpush3.bf16.msra.mxu1 %v1462_v36  ;;  %v902_v50 = vld [vmem:[%s1902_s7 + $0xc8] sm:$0xff]  ;;  %v915_v36 = vld [vmem:[%s1902_s7 + $0x130] sm:$0xff] }
 0x11f   :  { %1369 = vmatprep.subr.bf16.mxu0 %v1368_v51  ;;  %1465 = vmatprep.subr.bf16.mxu1 %v1464_v37  ;;  %v1470_v51 = vpack.c.bf16 %v884_v48, %v883_v43  ;;  %v1472_v52 = vpack.c.bf16 %v902_v50, %v901_v49  ;;  %v921_v43 = vld [vmem:[%s1902_s7 + $0x160] sm:$0xff]  ;;  %v922_v48 = vld [vmem:[%s1902_s7 + $0x168] sm:$0xff]  ;;  %v923_v50 = vld [vmem:[%s1902_s7 + $0x170] sm:$0xff] }
 0x120   :  { %v1507_v49 = vpack.c.bf16 %v922_v48, %v921_v43 }
 0x122   :  { %1371 = vmatpush1.bf16.msra.mxu0 %v1370_v56  ;;  %1467 = vmatpush3.bf16.msra.mxu1 %v1466_v42  ;;  %v904_v56 = vld [vmem:[%s1902_s7 + $0xd8] sm:$0xff] }
 0x123   :  { %1373 = vmatprep.subr.bf16.mxu0 %v1372_v57  ;;  %v1474_v57 = vpack.c.bf16 %v886_v54, %v885_v53  ;;  %v1476_v58 = vpack.c.bf16 %v904_v56, %v903_v55  ;;  %v920_v42 = vld [vmem:[%s1902_s7 + $0x158] sm:$0xff] }
 0x126   :  { %1375 = vmatpush1.bf16.msra.mxu0 %v1374_v62  ;;  %v906_v62 = vld [vmem:[%s1902_s7 + $0xe8] sm:$0xff] }
 0x127   :  { %1377 = vmatprep.subr.bf16.mxu0 %v1376_v63  ;;  %v1478_v63 = vpack.c.bf16 %v888_v60, %v887_v59  ;;  %v1480_v2 = vpack.c.bf16 %v906_v62, %v905_v61 }
 0x12a   :  { %1379 = vmatpush1.bf16.msra.mxu0 %v1378_v6  ;;  %v907_v6 = vld [vmem:[%s1902_s7 + $0xf0] sm:$0xff] }
 0x12b   :  { %1381 = vmatprep.subr.bf16.mxu0 %v1380_v7  ;;  %v908_v7 = vld [vmem:[%s1902_s7 + $0xf8] sm:$0xff] }
 0x12c   :  { %v1484_v8 = vpack.c.bf16 %v908_v7, %v907_v6 }
 0x12e   :  { %1383 = vmatpush1.bf16.msra.mxu0 %v1382_v13  ;;  %v1582_v13 = vmov 0.0|0.0  }
 0x12f   :  { %1385 = vmatprep.subr.bf16.mxu0 %v1384_v14 }
 0x132   :  { %1387 = vmatpush1.bf16.msra.mxu0 %v1386_v19 }
 0x133   :  { %1389 = vmatprep.subr.bf16.mxu0 %v1388_v20 }
 0x136   :  { %1391 = vmatpush1.bf16.msra.mxu0 %v1390_v23 }
 0x139   :  { %728 = vmatmul.mubr.f32.vlgmr.msra.gmra.mrb[2].mxu0 %v381_v40  ;;  %v899_v40 = vld [vmem:[%s1902_s7 + $0xb0] sm:$0xff] }
 0x13a   :  { %v1468_v1 = vpack.c.bf16 %v900_v41, %v899_v40  ;;  %v1501_v40 = vpack.c.bf16 %v918_v39, %v917_v38  ;;  %v919_v41 = vld [vmem:[%s1902_s7 + $0x150] sm:$0xff] }
 0x13c   :  { %1469 = vmatprep.subr.bf16.mxu1 %v1468_v1  ;;  %v1504_v1 = vpack.c.bf16 %v920_v42, %v919_v41 }
 0x13d   :  { %1471 = vmatpush3.bf16.msra.mxu1 %v1470_v51  ;;  %v924_v51 = vld [vmem:[%s1902_s7 + $0x178] sm:$0xff] }
 0x13e   :  { %1473 = vmatprep.subr.bf16.mxu1 %v1472_v52  ;;  %v1510_v52 = vpack.c.bf16 %v924_v51, %v923_v50 }
 0x141   :  { %1475 = vmatpush3.bf16.msra.mxu1 %v1474_v57  ;;  %v1097_v57 = vld [vmem:[%s1903_s8] ss:$0 sm:$0xff] }
 0x142   :  { %1477 = vmatprep.subr.bf16.mxu1 %v1476_v58 }
 0x145   :  { %1479 = vmatpush3.bf16.msra.mxu1 %v1478_v63 }
 0x146   :  { %1481 = vmatprep.subr.bf16.mxu1 %v1480_v2  ;;  %v1529_v2 = vld [vmem:[%s1896_s1] sm:$0xff] }
 0x149   :  { %1483 = vmatpush3.bf16.msra.mxu1 %v1482_v5 }
 0x14a   :  { %1485 = vmatprep.subr.bf16.mxu1 %v1484_v8 }
 0x14d   :  { %1487 = vmatpush3.bf16.msra.mxu1 %v1486_v12 }
 0x14e   :  { %1488 = vmatprep.subr.bf16.mxu1 %v1582_v13 }
 0x1cc   :  { %v1131_v14 = vpop.f32.mrb[2].mxu1 }
 0x1cd   :  { %v1132_v15 = vpop.f32.mrb[3].mxu1 }
 0x1ce   :  { %v1133_v16 = vadd.f32 %v1132_v15, %v1131_v14 }
 0x1d0   :  { %v801_v21 = vadd.f32 %v1133_v16, %v588_v18 }
 0x1ec   :  { %v1166_v19 = vpop.f32.mrb[4].mxu1 }
 0x1ed   :  { %v1167_v20 = vpop.f32.mrb[5].mxu1 }
 0x1ee   :  { %v1168_v22 = vadd.f32 %v1167_v20, %v1166_v19 }
 0x1f0   :  { %v871_v23 = vadd.f32 %v1168_v22, %v801_v21 }
 0x1f2   :  { %v876_v53 = vmax.f32 %v871_v23, 0.0 }
 0x20c   :  { %v729_v26 = vpop.f32.mrb[2].mxu0 }
 0x20d   :  { %v1512_v27 = vadd.f32 %v729_v26, %v580_v24  ;;  %v731_v28 = vpop.f32.mrb[3].mxu0 }
 0x20e   :  { %v1513_v30 = vadd.f32 %v731_v28, %v584_v25 }
 0x20f   :  { %v874_v33 = vmax.f32 %v1512_v27, 0.0 }
 0x210   :  { %v875_v31 = vmax.f32 %v1513_v30, 0.0 }
 0x212   :  { %996 = vmatprep.mubr.f32.mxu1 %v875_v31 }
 0x213   :  { %997 = vmatmul.mubr.f32.vlgmr.msra.gmra.mrb[6].mxu1 %v874_v33 }
 0x214   :  { %1490 = vmatpush3.bf16.msra.mxu1 %v1489_v32  ;;  %1253 = vmatprep.mubr.msk.f32.mxu1 %vm1583_vm2, %v1581_v0  ;;  %v916_v0 = vld [vmem:[%s1902_s7 + $0x138] sm:$0xff]  ;;  %s1584_s7 = smov [#allocation5]  }
 0x215   :  { %1491 = vmatprep.subr.bf16.mxu1 %v1582_v13  ;;  %v1498_v37 = vpack.c.bf16 %v916_v0, %v915_v36  ;;  %s1084_s25 = sshll.u32 %s1584_s7, 4  ;;  %s1085_s25 = int_to_ptr.vmem [resolvable:$true] %s1084_s25 }
 0x216   :  { %s1552_s27 = scalar_lea.vmem %s1085_s25, 128  ;;  %p1557_p9 = scmp.lt.s32.totalorder %s1085_s25, %s1085_s25 }
 0x217   :  { %p1553_p8 = scmp.ne.s32.totalorder %s1085_s25, %s1552_s27  ;;  %p1558_p10 = scmp.lt.s32.totalorder %s1552_s27, %s1552_s27 }
 0x218   :  { %1493 = vmatpush3.bf16.msra.mxu1 %v1492_v47 }
 0x219   :  { %1494 = vmatprep.subr.bf16.mxu1 %v1582_v13  ;;  %p1559_p11 = por %p1558_p10, %p1557_p9 }
 0x21b   :  { %p1560_p12 = pnand %p1559_p11, %p1553_p8 }
 0x21c   :  { %1496 = vmatpush3.bf16.msra.mxu1 %v1495_v35 }
 0x21d   :  { %1497 = vmatprep.subr.bf16.mxu1 %v1582_v13 }
 0x220   :  { %1499 = vmatpush3.bf16.msra.mxu1 %v1498_v37 }
 0x221   :  { %1500 = vmatprep.subr.bf16.mxu1 %v1582_v13 }
 0x224   :  { %1502 = vmatpush3.bf16.msra.mxu1 %v1501_v40 }
 0x225   :  { %1503 = vmatprep.subr.bf16.mxu1 %v1582_v13 }
 0x228   :  { %1505 = vmatpush3.bf16.msra.mxu1 %v1504_v1 }
 0x229   :  { %1506 = vmatprep.subr.bf16.mxu1 %v1582_v13 }
 0x22c   :  { %1508 = vmatpush3.bf16.msra.mxu1 %v1507_v49 }
 0x22d   :  { %1509 = vmatprep.subr.bf16.mxu1 %v1582_v13 }
 0x230   :  { %1511 = vmatpush3.bf16.msra.mxu1 %v1510_v52 }
 0x233   :  { %1254 = vmatmul.mubr.f32.vlgmr.msra.gmra.mrb[8].mxu1 %v876_v53 }
 0x2e6   :  { %v1201_v54 = vpop.f32.mrb[6].mxu1 }
 0x2e7   :  { %v1202_v55 = vpop.f32.mrb[7].mxu1 }
 0x2e8   :  { %v1203_v56 = vadd.f32 %v1202_v55, %v1201_v54 }
 0x2ea   :  { %v999_v58 = vadd.f32 %v1203_v56, %v1097_v57 }
 0x306   :  { %v1068_v59 = vpop.f32.mrb[8].mxu1 }
 0x307   :  { %v1069_v60 = vadd.f32 %v1068_v59, %v999_v58  ;;  %v1255_v61 = vpop.f32.mrb[9].mxu1 }
 0x309   :  { %1527 = vtanh.f32 %v1069_v60 }
 0x313   :  { %v1528_v62 = vpop.eup %1527 }
 0x314   :  { %v1073_v63 = vmul.f32 0.05, %v1528_v62 }
 0x316   :  { %v1074_v3 = vadd.f32 %v1529_v2, %v1073_v63 }
 0x318   :  { %v1098_v4 = vclamps-f32 %v1074_v3, 1.0 }
 0x31a   :  { %1077 = vst.msk [vmem:[#allocation5] sm:$0xff] %vm61_vm0, %v1098_v4 }
 0x31b   :  { %1563 = shalt.err (!%p1560_p12)
}
 0x31c   :  { %s1564_s2 = scalar_lea.hbm %s1904_s9, 128 }
 0x31d   :  { %p1565_p13 = scmp.ne.s32.totalorder %s1904_s9, %s1564_s2  ;;  %p1568_p0 = scmp.lt.u32.totalorder %s1564_s2, %s1904_s9 }
 0x31f   :  { %p1570_p1 = pnand %p1568_p0, %p1565_p13 }
 0x321   :  { %1573 = shalt.err (!%p1570_p1)
}
 0x322   :  { %1087 = dma.vmem_to_hbm [thread:$0]  %s1085_s25, 128, %s1904_s9, [#allocation4]  }
 0x323   :  { %1576 = dma.done.wait [#allocation4], 128  }
 0x324   :  { %1577 = vsyncadd [#allocation4], 4294967168 }
 0x325   :  { %1091 = vsyncpa [#allocation3], 1 }
 0x326   :  { %1092 = vsyncpa [#allocation4], 1 }

</bundles_post_ra>
